<compile_context>
chip_gen: v7x
topology: tpu7x:2x2x1
jax: 0.10.0
libtpu: 0.0.40
codegen_flags: <defaults>
</compile_context>

<pallas_src>
import jax
import jax.numpy as jnp
from jax.experimental import pallas as pl
from jax.experimental.pallas import tpu as pltpu


# ----------------------------------------------------------------------------
# Slice bookkeeping (mirrors ParallelReservoirs.__init__).
# ----------------------------------------------------------------------------
def _compute_slices(reservoirs, share_inputs):
    state_slices, input_slices = [], []
    s_off, i_off, num_inputs = 0, 0, 0
    for res in reservoirs:
        n, d = res["num_states"], res["num_inputs"]
        state_slices.append((s_off, n))
        s_off += n
        if share_inputs:
            input_slices.append((0, d))
            num_inputs = max(num_inputs, d)
        else:
            input_slices.append((i_off, d))
            i_off += d
            num_inputs += d
    return tuple(state_slices), tuple(input_slices), s_off, num_inputs


# ----------------------------------------------------------------------------
# One-time weight fusion: the whole bank becomes a single block-structured
# (W_hh, W_ih, b).  Reservoir independence is preserved exactly by the zero
# off-diagonal blocks; the kernel gets one wide lane-dense matmul per term,
# one bias row, one unmasked store — no per-reservoir slicing or concat.
# ----------------------------------------------------------------------------
def combine_reservoir_params(reservoirs, share_inputs=False, weight_dtype=None):
    state_slices, input_slices, total_states, total_inputs = _compute_slices(
        reservoirs, share_inputs)
    wdt = weight_dtype if weight_dtype is not None else reservoirs[0]["w_hh"].dtype
    w_hh = jnp.zeros((total_states, total_states), wdt)
    w_ih = jnp.zeros((max(total_inputs, 1), total_states), wdt)
    b = jnp.zeros((1, total_states), jnp.float32)          # bias/tanh stay f32
    for res, (s0, sn), (i0, dn) in zip(reservoirs, state_slices, input_slices):
        w_hh = w_hh.at[s0:s0 + sn, s0:s0 + sn].set(res["w_hh"].astype(wdt))
        w_ih = w_ih.at[i0:i0 + dn, s0:s0 + sn].set(res["w_ih"].astype(wdt))
        b = b.at[0, s0:s0 + sn].set(res["b"].astype(jnp.float32))
    return dict(w_hh=w_hh, w_ih=w_ih, b=b,
                num_states=total_states, num_inputs=total_inputs,
                share_inputs=share_inputs)


def _nbytes(x):
    return int(x.size) * x.dtype.itemsize


def _compiler_params(resident_bytes, dimension_semantics=None):
    # Resident set x2 (double buffering) + headroom, capped at v7x's
    # 64 MiB/TC physical VMEM (v5e/v6e have 128 MiB; default scoped limits are
    # 16/32 MiB, so raising it explicitly matters for non-toy banks).
    limit = int(min(max(2 * resident_bytes + (8 << 20), 32 << 20), 64 << 20))
    return pltpu.CompilerParams(dimension_semantics=dimension_semantics,
                                vmem_limit_bytes=limit)


# ----------------------------------------------------------------------------
# Single-step kernel (matches ParallelReservoirs.forward exactly).
# ----------------------------------------------------------------------------
def _make_step_kernel(has_input):
    if has_input:
        def kernel(state_ref, inp_ref, whh_ref, wih_ref, b_ref, out_ref):
            h = jnp.dot(state_ref[...].astype(whh_ref.dtype), whh_ref[...],
                        preferred_element_type=jnp.float32)
            h = h + jnp.dot(inp_ref[...].astype(wih_ref.dtype), wih_ref[...],
                            preferred_element_type=jnp.float32)
            h = h + b_ref[...]
            out_ref[...] = jnp.tanh(h).astype(out_ref.dtype)
    else:
        def kernel(state_ref, whh_ref, b_ref, out_ref):
            h = jnp.dot(state_ref[...].astype(whh_ref.dtype), whh_ref[...],
                        preferred_element_type=jnp.float32)
            h = h + b_ref[...]
            out_ref[...] = jnp.tanh(h).astype(out_ref.dtype)
    return kernel


def parallel_reservoirs_forward(state, inp, combined):
    """One step: next_state = concat_r tanh(s_r @ W_hh_r + x_r @ W_ih_r + b_r)."""
    assert state.ndim == 2, state.shape
    ts, ti = combined["num_states"], combined["num_inputs"]
    assert state.shape[-1] == ts, (state.shape, ts)
    has_input = inp is not None
    if has_input:
        assert inp.ndim == 2, inp.shape
        if combined["share_inputs"]:
            # Relaxed (review): a shared input wider than the widest reservoir
            # is fine — every reservoir reads only input[:, :num_inputs_r].
            assert inp.shape[-1] >= ti, (inp.shape, ti)
            if inp.shape[-1] != ti:
                inp = inp[:, :ti]
        else:
            assert inp.shape[-1] == ti, (inp.shape, ti)

    B = state.shape[0]
    operands = [state]
    if has_input:
        operands.append(inp)
    operands.append(combined["w_hh"])
    if has_input:
        operands.append(combined["w_ih"])
    operands.append(combined["b"])

    flops = 2 * B * ts * ts + (2 * B * ti * ts if has_input else 0)
    op_bytes = sum(_nbytes(x) for x in operands) + B * ts * state.dtype.itemsize
    vmem = pl.BlockSpec(memory_space=pltpu.MemorySpace.VMEM)
    return pl.pallas_call(
        _make_step_kernel(has_input),
        in_specs=[vmem] * len(operands),
        out_specs=vmem,
        out_shape=jax.ShapeDtypeStruct((B, ts), state.dtype),
        cost_estimate=pl.CostEstimate(flops=flops, transcendentals=B * ts,
                                      bytes_accessed=op_bytes),
        compiler_params=_compiler_params(op_bytes),
    )(*operands)


# ----------------------------------------------------------------------------
# Sequence kernel: grid=(T,), weights VMEM-resident, state carried in VMEM.
# ----------------------------------------------------------------------------
def _scan_kernel(init_ref, inp_ref, whh_ref, wih_ref, b_ref, out_ref, state_scr):
    @pl.when(pl.program_id(0) == 0)
    def _():
        state_scr[...] = init_ref[...].astype(jnp.float32)

    h = jnp.dot(state_scr[...].astype(whh_ref.dtype), whh_ref[...],
                preferred_element_type=jnp.float32)
    h = h + jnp.dot(inp_ref[0].astype(wih_ref.dtype), wih_ref[...],
                    preferred_element_type=jnp.float32)
    h = h + b_ref[...]
    nxt = jnp.tanh(h)
    state_scr[...] = nxt                       # in-place recurrent state (VMEM)
    out_ref[0] = nxt.astype(out_ref.dtype)     # lane-dense per-step store


def parallel_reservoirs_scan(init_state, inputs, combined):
    """Run T steps in ONE pallas_call.  Returns the state trajectory
    (T, B, num_states).  Weights/bias/init use constant index_maps (loaded to
    VMEM once, never re-DMA'd); only input[t] streams in and state[t] streams
    out each grid step."""
    # TODO(synk): autonomous (inputs=None) scan variant.
    assert init_state.ndim == 2 and inputs.ndim == 3, (init_state.shape, inputs.shape)
    ts, ti = combined["num_states"], combined["num_inputs"]
    assert init_state.shape[-1] == ts, (init_state.shape, ts)
    if combined["share_inputs"]:
        assert inputs.shape[-1] >= ti, (inputs.shape, ti)
        if inputs.shape[-1] != ti:
            inputs = inputs[..., :ti]
    else:
        assert inputs.shape[-1] == ti, (inputs.shape, ti)
    T, B = inputs.shape[0], init_state.shape[0]
    assert inputs.shape[1] == B, (inputs.shape, B)

    w_hh, w_ih, b = combined["w_hh"], combined["w_ih"], combined["b"]
    flops = T * (2 * B * ts * ts + 2 * B * ti * ts)
    touched = (_nbytes(w_hh) + _nbytes(w_ih) + _nbytes(b) + _nbytes(init_state)
               + _nbytes(inputs) + T * B * ts * init_state.dtype.itemsize)
    resident = (_nbytes(w_hh) + _nbytes(w_ih) + _nbytes(b) + _nbytes(init_state)
                + 2 * B * ti * inputs.dtype.itemsize
                + 2 * B * ts * init_state.dtype.itemsize
                + B * ts * 4)

    grid_spec = pltpu.PrefetchScalarGridSpec(
        num_scalar_prefetch=0,
        grid=(T,),
        in_specs=[
            pl.BlockSpec((B, ts), lambda t: (0, 0)),        # init state (resident)
            pl.BlockSpec((1, B, ti), lambda t: (t, 0, 0)),  # input[t]   (streamed)
            pl.BlockSpec((ts, ts), lambda t: (0, 0)),       # W_hh       (resident)
            pl.BlockSpec((ti, ts), lambda t: (0, 0)),       # W_ih       (resident)
            pl.BlockSpec((1, ts), lambda t: (0, 0)),        # bias       (resident)
        ],
        out_specs=pl.BlockSpec((1, B, ts), lambda t: (t, 0, 0)),
        scratch_shapes=[pltpu.VMEM((B, ts), jnp.float32)],  # carried state
    )
    return pl.pallas_call(
        _scan_kernel,
        grid_spec=grid_spec,
        out_shape=jax.ShapeDtypeStruct((T, B, ts), init_state.dtype),
        cost_estimate=pl.CostEstimate(flops=flops, transcendentals=T * B * ts,
                                      bytes_accessed=touched),
        compiler_params=_compiler_params(resident,
                                         dimension_semantics=("arbitrary",)),
    )(init_state, inputs, w_hh, w_ih, b)


# ----------------------------------------------------------------------------
# Parameter init + pure-JAX references (mirror the PyTorch per-reservoir math).
# ----------------------------------------------------------------------------
def init_esn_params(key, num_states, num_inputs, scale=0.1, dtype=jnp.float32):
    k1, k2, k3 = jax.random.split(key, 3)
    w_hh = scale * jax.random.normal(k1, (num_states, num_states), dtype)
    w_ih = scale * jax.random.normal(k2, (num_inputs, num_states), dtype)
    b = scale * jax.random.normal(k3, (num_states,), dtype)
    return dict(w_hh=w_hh, w_ih=w_ih, b=b,
                num_states=num_states, num_inputs=num_inputs)


def reference_forward(state, inp, reservoirs, share_inputs=False):
    state_slices, input_slices, _, _ = _compute_slices(reservoirs, share_inputs)
    outs = []
    for res, (s0, sn), (i0, dn) in zip(reservoirs, state_slices, input_slices):
        h = state[:, s0:s0 + sn] @ res["w_hh"] + res["b"][None, :]
        if inp is not None:
            h = h + inp[:, i0:i0 + dn] @ res["w_ih"]
        outs.append(jnp.tanh(h))
    return jnp.concatenate(outs, axis=-1)


def reference_scan(init_state, inputs, reservoirs, share_inputs=False):
    s, traj = init_state, []
    for t in range(inputs.shape[0]):
        s = reference_forward(s, inputs[t], reservoirs, share_inputs)
        traj.append(s)
    return jnp.stack(traj, axis=0)


def _check(name, got, want, atol, rtol):
    diff = float(jnp.max(jnp.abs(got.astype(jnp.float32) - want.astype(jnp.float32))))
    assert bool(jnp.allclose(got, want, atol=atol, rtol=rtol)), (
        f"{name}: max abs diff {diff}")


if __name__ == "__main__":
    key = jax.random.PRNGKey(0)
    k_state, k_inp, k_seq, kr0, kr1, kr2 = jax.random.split(key, 6)

    # Heterogeneous bank; concatenated state is lane-dense (8 sublanes x 128).
    B = 8
    specs = [(64, 16), (32, 8), (32, 8)]          # (num_states, num_inputs)
    reservoirs = [init_esn_params(k, n, d)
                  for k, (n, d) in zip([kr0, kr1, kr2], specs)]
    TOTAL_STATES = sum(n for n, _ in specs)       # 128
    TOTAL_INPUTS = sum(d for _, d in specs)       # 32

    state = jax.random.normal(k_state, (B, TOTAL_STATES), jnp.float32)
    inp = jax.random.normal(k_inp, (B, TOTAL_INPUTS), jnp.float32)

    comb_split = combine_reservoir_params(reservoirs, share_inputs=False)
    comb_shared = combine_reservoir_params(reservoirs, share_inputs=True)
    comb_bf16 = combine_reservoir_params(reservoirs, share_inputs=False,
                                         weight_dtype=jnp.bfloat16)

    # Tolerances cover XLA-vs-Mosaic default f32 matmul precision (bf16-pass)
    # differences; structural errors produce O(0.1-1) diffs and are still caught.
    # 1) disjoint per-reservoir input slices.
    out = jax.block_until_ready(parallel_reservoirs_forward(state, inp, comb_split))
    ref = reference_forward(state, inp, reservoirs, share_inputs=False)
    assert out.shape == (B, TOTAL_STATES), out.shape
    _check("split-input", out, ref, atol=1e-2, rtol=1e-2)

    # 2) input=None -> no W_ih matmul, W_ih not even passed / DMA'd.
    out_ni = jax.block_until_ready(parallel_reservoirs_forward(state, None, comb_split))
    ref_ni = reference_forward(state, None, reservoirs, share_inputs=False)
    _check("no-input", out_ni, ref_ni, atol=1e-2, rtol=1e-2)

    # 3) share_inputs=True with a shared input WIDER than the widest reservoir.
    inp_shared = jax.random.normal(jax.random.fold_in(key, 7), (B, 24), jnp.float32)
    out_sh = jax.block_until_ready(
        parallel_reservoirs_forward(state, inp_shared, comb_shared))
    ref_sh = reference_forward(state, inp_shared, reservoirs, share_inputs=True)
    _check("shared-input", out_sh, ref_sh, atol=1e-2, rtol=1e-2)

    # 4) time loop inside the kernel: grid=(T,), weights VMEM-resident.
    T = 6
    inp_seq = jax.random.normal(k_seq, (T, B, TOTAL_INPUTS), jnp.float32)
    traj = jax.block_until_ready(parallel_reservoirs_scan(state, inp_seq, comb_split))
    ref_traj = reference_scan(state, inp_seq, reservoirs, share_inputs=False)
    assert traj.shape == (T, B, TOTAL_STATES), traj.shape
    _check("scan", traj, ref_traj, atol=2e-2, rtol=2e-2)

    # 5) bf16 weights (half DMA/VMEM, MXU-native), f32 accumulate + tanh.
    out_bf = jax.block_until_ready(parallel_reservoirs_forward(state, inp, comb_bf16))
    _check("bf16-weights", out_bf, ref, atol=5e-2, rtol=5e-2)

    print("KERNEL_OK")
</pallas_src>

<mosaic_0001>
module attributes {stable_mosaic.version = 11 : i64} {
  func.func @kernel(%arg0: memref<8x128xf32, #tpu.memory_space<vmem>>, %arg1: memref<8x32xf32, #tpu.memory_space<vmem>>, %arg2: memref<128x128xf32, #tpu.memory_space<vmem>>, %arg3: memref<32x128xf32, #tpu.memory_space<vmem>>, %arg4: memref<1x128xf32, #tpu.memory_space<vmem>>, %arg5: memref<8x128xf32, #tpu.memory_space<vmem>>) attributes {dimension_semantics = [], scalar_prefetch = 0 : i64, scratch_operands = 0 : i64, tpu.core_type = #tpu.core_type<tc>} {
    %c0 = arith.constant 0 : index
    %c0_0 = arith.constant 0 : index
    %0 = vector.load %arg0[%c0, %c0_0] : memref<8x128xf32, #tpu.memory_space<vmem>>, vector<8x128xf32>
    %c0_1 = arith.constant 0 : index
    %c0_2 = arith.constant 0 : index
    %1 = vector.load %arg2[%c0_1, %c0_2] : memref<128x128xf32, #tpu.memory_space<vmem>>, vector<128x128xf32>
    %cst = arith.constant dense<0.000000e+00> : vector<8x128xf32>
    %2 = tpu.matmul %0, %1, %cst {dimension_numbers = #tpu.dot_dimension_numbers<[1], [0], [0], [1], [0, 0, 1, 1], [], []>} : vector<8x128xf32>, vector<128x128xf32>, vector<8x128xf32> -> vector<8x128xf32>
    %c0_3 = arith.constant 0 : index
    %c0_4 = arith.constant 0 : index
    %3 = vector.load %arg1[%c0_3, %c0_4] : memref<8x32xf32, #tpu.memory_space<vmem>>, vector<8x32xf32>
    %c0_5 = arith.constant 0 : index
    %c0_6 = arith.constant 0 : index
    %4 = vector.load %arg3[%c0_5, %c0_6] : memref<32x128xf32, #tpu.memory_space<vmem>>, vector<32x128xf32>
    %cst_7 = arith.constant dense<0.000000e+00> : vector<8x128xf32>
    %5 = tpu.matmul %3, %4, %cst_7 {dimension_numbers = #tpu.dot_dimension_numbers<[1], [0], [0], [1], [0, 0, 1, 1], [], []>} : vector<8x32xf32>, vector<32x128xf32>, vector<8x128xf32> -> vector<8x128xf32>
    %6 = arith.addf %2, %5 : vector<8x128xf32>
    %c0_8 = arith.constant 0 : index
    %c0_9 = arith.constant 0 : index
    %7 = vector.load %arg4[%c0_8, %c0_9] : memref<1x128xf32, #tpu.memory_space<vmem>>, vector<1x128xf32>
    %8 = vector.broadcast %7 : vector<1x128xf32> to vector<8x128xf32>
    %9 = arith.addf %6, %8 : vector<8x128xf32>
    %10 = math.tanh %9 : vector<8x128xf32>
    %c0_10 = arith.constant 0 : index
    %c0_11 = arith.constant 0 : index
    %11 = vector.load %arg5[%c0_10, %c0_11] : memref<8x128xf32, #tpu.memory_space<vmem>>, vector<8x128xf32>
    tpu.vector_store %arg5[%c0_10, %c0_11], %10 {strides = array<i32>} : memref<8x128xf32, #tpu.memory_space<vmem>>, vector<8x128xf32>,
    return
  }
}

</mosaic_0001>

<bundles_post_ra>
// kernel: tpu_custom_call.1
= control target key start
LH: loop header
LB: loop body
LE: loop exit
PB: predicated region body
PF: predicated region fallthrough
CT: control target
= control target key end

     0   :  { %10 = vsyncpa [#allocation3], 0  ;;  %s598_s0 = inlined_call_operand.hbm [shape: f32[8,128], index: 0, kind: input, shape index: {}]   ;;  %s599_s1 = inlined_call_operand.hbm [shape: f32[8,32], index: 1, kind: input, shape index: {}]   ;;  %s600_s2 = inlined_call_operand.hbm [shape: f32[128,128], index: 2, kind: input, shape index: {}]   ;;  %s601_s3 = inlined_call_operand.hbm [shape: f32[32,128], index: 3, kind: input, shape index: {}]   ;;  %s602_s4 = inlined_call_operand.vmem [shape: f32[1,128], index: 4, kind: input, shape index: {}]   ;;  %s603_s5 = inlined_call_operand.hbm [shape: f32[8,128], index: 5, kind: output, shape index: {}]  }
   0x1   :  { %11 = vsyncpa [#allocation6], 0 }
   0x2   :  { %12 = vsyncpa [#allocation9], 0 }
   0x3   :  { %13 = vsyncpa [#allocation4], 0  ;;  %s495_s18 = smov [#allocation5]   ;;  %s496_s20 = smov [#allocation2]  }
   0x4   :  { %s30_s19 = sshll.u32 %s495_s18, 4  ;;  %s20_s21 = sshll.u32 %s496_s20, 4  ;;  %s31_s19 = int_to_ptr.vmem [resolvable:$true] %s30_s19  ;;  %s21_s21 = int_to_ptr.vmem [resolvable:$true] %s20_s21 }
   0x5   :  { %s377_s24 = scalar_lea.hbm %s599_s1, 128 }
   0x6   :  { %p378_p0 = scmp.ne.s32.totalorder %s599_s1, %s377_s24  ;;  %p381_p1 = scmp.lt.u32.totalorder %s377_s24, %s599_s1 }
   0x8   :  { %p383_p2 = pnand %p381_p1, %p378_p0 }
   0xa   :  { %386 = shalt.err (!%p383_p2)
}
   0xb   :  { %s387_s29 = scalar_lea.vmem %s31_s19, 128  ;;  %p392_p4 = scmp.lt.s32.totalorder %s31_s19, %s31_s19 }
   0xc   :  { %p388_p3 = scmp.ne.s32.totalorder %s31_s19, %s387_s29  ;;  %p393_p5 = scmp.lt.s32.totalorder %s387_s29, %s387_s29 }
   0xe   :  { %p394_p6 = por %p393_p5, %p392_p4 }
  0x10   :  { %p395_p7 = pnand %p394_p6, %p388_p3 }
  0x12   :  { %398 = shalt.err (!%p395_p7)
}
  0x13   :  { %33 = dma.hbm_to_vmem [thread:$0]  %s599_s1, 128, %s31_s19, [#allocation6]  }
  0x14   :  { %s399_s9 = scalar_lea.hbm %s598_s0, 128 }
  0x15   :  { %p400_p8 = scmp.ne.s32.totalorder %s598_s0, %s399_s9  ;;  %p403_p9 = scmp.lt.u32.totalorder %s399_s9, %s598_s0 }
  0x17   :  { %p405_p10 = pnand %p403_p9, %p400_p8 }
  0x19   :  { %408 = shalt.err (!%p405_p10)
}
  0x1a   :  { %s409_s14 = scalar_lea.vmem %s21_s21, 128  ;;  %p414_p12 = scmp.lt.s32.totalorder %s21_s21, %s21_s21 }
  0x1b   :  { %p410_p11 = scmp.ne.s32.totalorder %s21_s21, %s409_s14  ;;  %p415_p13 = scmp.lt.s32.totalorder %s409_s14, %s409_s14 }
  0x1d   :  { %p416_p0 = por %p415_p13, %p414_p12 }
  0x1f   :  { %p417_p1 = pnand %p416_p0, %p410_p11 }
  0x21   :  { %420 = shalt.err (!%p417_p1)
}
  0x22   :  { %23 = dma.hbm_to_vmem [thread:$0]  %s598_s0, 128, %s21_s21, [#allocation3]  }
  0x23   :  { %s497_s16 = smov [#allocation7]   ;;  %s421_s20 = scalar_lea.hbm %s600_s2, 2048 }
  0x24   :  { %s39_s17 = sshll.u32 %s497_s16, 4  ;;  %p422_p2 = scmp.ne.s32.totalorder %s600_s2, %s421_s20  ;;  %s40_s17 = int_to_ptr.vmem [resolvable:$true] %s39_s17 }
  0x25   :  { %p425_p3 = scmp.lt.u32.totalorder %s421_s20, %s600_s2 }
  0x27   :  { %p427_p4 = pnand %p425_p3, %p422_p2 }
  0x29   :  { %430 = shalt.err (!%p427_p4)
}
  0x2a   :  { %s431_s26 = scalar_lea.vmem %s40_s17, 2048  ;;  %p436_p6 = scmp.lt.s32.totalorder %s40_s17, %s40_s17 }
  0x2b   :  { %p432_p5 = scmp.ne.s32.totalorder %s40_s17, %s431_s26  ;;  %p437_p7 = scmp.lt.s32.totalorder %s431_s26, %s431_s26 }
  0x2d   :  { %p438_p8 = por %p437_p7, %p436_p6 }
  0x2f   :  { %p439_p9 = pnand %p438_p8, %p432_p5 }
  0x31   :  { %442 = shalt.err (!%p439_p9)
}
  0x32   :  { %s498_s0 = smov 128   ;;  %s499_s21 = smov 8  }
  0x33   :  { %45 = dma.hbm_to_vmem [thread:$0]  %s600_s2, 2048, %s40_s17, [#allocation6], %s498_s0, %s498_s0, %s499_s21  }
  0x34   :  { %s500_s29 = smov [#allocation8]   ;;  %s443_s8 = scalar_lea.hbm %s601_s3, 512 }
  0x35   :  { %s51_s30 = sshll.u32 %s500_s29, 4  ;;  %p444_p10 = scmp.ne.s32.totalorder %s601_s3, %s443_s8  ;;  %s52_s30 = int_to_ptr.vmem [resolvable:$true] %s51_s30 }
  0x36   :  { %p447_p11 = scmp.lt.u32.totalorder %s443_s8, %s601_s3 }
  0x38   :  { %p449_p12 = pnand %p447_p11, %p444_p10 }
  0x3a   :  { %452 = shalt.err (!%p449_p12)
}
  0x3b   :  { %s453_s13 = scalar_lea.vmem %s52_s30, 512  ;;  %p458_p0 = scmp.lt.s32.totalorder %s52_s30, %s52_s30 }
  0x3c   :  { %p454_p13 = scmp.ne.s32.totalorder %s52_s30, %s453_s13  ;;  %p459_p1 = scmp.lt.s32.totalorder %s453_s13, %s453_s13 }
  0x3e   :  { %p460_p2 = por %p459_p1, %p458_p0 }
  0x40   :  { %p461_p3 = pnand %p460_p2, %p454_p13 }
  0x42   :  { %464 = shalt.err (!%p461_p3)
}
  0x43   :  { %57 = dma.hbm_to_vmem [thread:$0]  %s601_s3, 512, %s52_s30, [#allocation9], %s498_s0, %s498_s0, %s499_s21  }
  0x44   :  { %487 = dma.done.wait [#allocation3], 128  }
  0x45   :  { %488 = vsyncadd [#allocation3], 4294967168 }
  0x46   :  { %489 = dma.done.wait [#allocation6], 2176  }
  0x47   :  { %490 = vsyncadd [#allocation6], 4294965120 }
  0x48   :  { %491 = dma.done.wait [#allocation9], 512  }
  0x49   :  { %492 = vsyncadd [#allocation9], 4294966784  ;;  %v501_v0 = vmov 0.0|0.0   ;;  %vm502_vm0 = vmmov 0   ;;  %v503_v1 = vmov 0.0   ;;  %v73_v2 = vld [vmem:[#allocation7] sm:$0xff] }
  0x4a   :  { %341 = vmatprep.subr.bf16.mxu1 %v501_v0  ;;  %335 = vmatprep.subr.bf16.mxu0 %v501_v0  ;;  %v74_v3 = vld [vmem:[#allocation7 + $0x8] sm:$0xff]  ;;  %v75_v4 = vld [vmem:[#allocation7 + $0x10] sm:$0xff]  ;;  %v76_v6 = vld [vmem:[#allocation7 + $0x18] sm:$0xff]  ;;  %vm94_vm1 = vcmask 261120   ;;  %s504_s15 = smov [#allocation10]  }
  0x4b   :  { %297 = vmatprep.mubr.msk.f32.mxu0 %vm502_vm0, %v503_v1  ;;  %332 = vmatprep.mubr.msk.f32.mxu1 %vm502_vm0, %v503_v1  ;;  %v342_v5 = vpack.c.bf16 %v74_v3, %v73_v2  ;;  %v345_v7 = vpack.c.bf16 %v76_v6, %v75_v4  ;;  %v77_v8 = vld [vmem:[#allocation7 + $0x20] sm:$0xff]  ;;  %v78_v9 = vld [vmem:[#allocation7 + $0x28] sm:$0xff]  ;;  %v92_v13 = vld [vmem:[#allocation8 + $0x10] sm:$0xff]  ;;  %s254_s16 = sshll.u32 %s504_s15, 4  ;;  %s255_s16 = int_to_ptr.vmem [resolvable:$true] %s254_s16 }
  0x4c   :  { %v90_v10 = vld [vmem:[#allocation8] sm:$0xff]  ;;  %v91_v11 = vld [vmem:[#allocation8 + $0x8] sm:$0xff]  ;;  %v93_v14 = vld [vmem:[#allocation8 + $0x18] sm:$0xff]  ;;  %v348_v15 = vpack.c.bf16 %v78_v9, %v77_v8  ;;  %s465_s17 = scalar_lea.vmem %s255_s16, 128  ;;  %p470_p5 = scmp.lt.s32.totalorder %s255_s16, %s255_s16 }
  0x4d   :  { %343 = vmatpush3.bf16.msra.mxu1 %v342_v5  ;;  %v336_v12 = vpack.c.bf16 %v91_v11, %v90_v10  ;;  %v339_v16 = vpack.c.bf16 %v93_v14, %v92_v13  ;;  %v79_v17 = vld [vmem:[#allocation7 + $0x30] sm:$0xff]  ;;  %v80_v18 = vld [vmem:[#allocation7 + $0x38] sm:$0xff]  ;;  %v81_v21 = vld [vmem:[#allocation7 + $0x40] sm:$0xff]  ;;  %p466_p4 = scmp.ne.s32.totalorder %s255_s16, %s465_s17  ;;  %p471_p6 = scmp.lt.s32.totalorder %s465_s17, %s465_s17 }
  0x4e   :  { %344 = vmatprep.subr.bf16.mxu1 %v501_v0  ;;  %v351_v19 = vpack.c.bf16 %v80_v18, %v79_v17  ;;  %v89_v20 = vld [vmem:[#allocation5] sm:$0xff]  ;;  %v82_v22 = vld [vmem:[#allocation7 + $0x48] sm:$0xff]  ;;  %v83_v24 = vld [vmem:[#allocation7 + $0x50] sm:$0xff] }
  0x4f   :  { %337 = vmatpush3.bf16.msra.mxu0 %v336_v12  ;;  %v354_v23 = vpack.c.bf16 %v82_v22, %v81_v21  ;;  %v84_v25 = vld [vmem:[#allocation7 + $0x58] sm:$0xff]  ;;  %v85_v27 = vld [vmem:[#allocation7 + $0x60] sm:$0xff]  ;;  %v86_v28 = vld [vmem:[#allocation7 + $0x68] sm:$0xff]  ;;  %p472_p7 = por %p471_p6, %p470_p5 }
  0x50   :  { %338 = vmatprep.subr.bf16.mxu0 %v501_v0  ;;  %v357_v26 = vpack.c.bf16 %v84_v25, %v83_v24  ;;  %v360_v29 = vpack.c.bf16 %v86_v28, %v85_v27  ;;  %v87_v30 = vld [vmem:[#allocation7 + $0x70] sm:$0xff]  ;;  %v88_v31 = vld [vmem:[#allocation7 + $0x78] sm:$0xff] }
  0x51   :  { %346 = vmatpush3.bf16.msra.mxu1 %v345_v7  ;;  %v363_v32 = vpack.c.bf16 %v88_v31, %v87_v30  ;;  %v72_v33 = vld [vmem:[#allocation2] sm:$0xff]  ;;  %p473_p8 = pnand %p472_p7, %p466_p4 }
  0x52   :  { %347 = vmatprep.subr.bf16.mxu1 %v501_v0  ;;  %v266_v37 = vld [vmem:[%s602_s4] ss:$0 sm:$0xff] }
  0x53   :  { %340 = vmatpush3.bf16.msra.mxu0 %v339_v16 }
  0x55   :  { %349 = vmatpush3.bf16.msra.mxu1 %v348_v15 }
  0x56   :  { %350 = vmatprep.subr.bf16.mxu1 %v501_v0  ;;  %298 = vmatmul.mubr.msk.f32.vlgmr.msra.gmra.mrb[0].mxu0 %vm94_vm1, %v89_v20 }
  0x59   :  { %352 = vmatpush3.bf16.msra.mxu1 %v351_v19 }
  0x5a   :  { %353 = vmatprep.subr.bf16.mxu1 %v501_v0 }
  0x5d   :  { %355 = vmatpush3.bf16.msra.mxu1 %v354_v23 }
  0x5e   :  { %356 = vmatprep.subr.bf16.mxu1 %v501_v0 }
  0x61   :  { %358 = vmatpush3.bf16.msra.mxu1 %v357_v26 }
  0x62   :  { %359 = vmatprep.subr.bf16.mxu1 %v501_v0 }
  0x65   :  { %361 = vmatpush3.bf16.msra.mxu1 %v360_v29 }
  0x66   :  { %362 = vmatprep.subr.bf16.mxu1 %v501_v0 }
  0x69   :  { %364 = vmatpush3.bf16.msra.mxu1 %v363_v32 }
  0x6c   :  { %333 = vmatmul.mubr.f32.vlgmr.msra.gmra.mrb[0].mxu1 %v72_v33 }
 0x129   :  { %v164_v34 = vpop.f32.mrb[0].mxu0 }
 0x12a   :  { %v299_v35 = vpop.f32.mrb[1].mxu0 }
 0x13f   :  { %v234_v36 = vpop.f32.mrb[0].mxu1 }
 0x140   :  { %v235_v38 = vadd.f32 %v234_v36, %v164_v34  ;;  %v334_v39 = vpop.f32.mrb[1].mxu1 }
 0x142   :  { %v245_v40 = vadd.f32 %v266_v37, %v235_v38 }
 0x144   :  { %375 = vtanh.f32 %v245_v40 }
 0x14e   :  { %v376_v41 = vpop.eup %375 }
 0x14f   :  { %247 = vst [vmem:[#allocation10] sm:$0xff] %v376_v41 }
 0x150   :  { %476 = shalt.err (!%p473_p8)
}
 0x151   :  { %s477_s4 = scalar_lea.hbm %s603_s5, 128 }
 0x152   :  { %p478_p9 = scmp.ne.s32.totalorder %s603_s5, %s477_s4  ;;  %p481_p10 = scmp.lt.u32.totalorder %s477_s4, %s603_s5 }
 0x154   :  { %p483_p11 = pnand %p481_p10, %p478_p9 }
 0x156   :  { %486 = shalt.err (!%p483_p11)
}
 0x157   :  { %257 = dma.vmem_to_hbm [thread:$0]  %s255_s16, 128, %s603_s5, [#allocation4]  }
 0x158   :  { %493 = dma.done.wait [#allocation4], 128  }
 0x159   :  { %494 = vsyncadd [#allocation4], 4294967168 }
 0x15a   :  { %261 = vsyncpa [#allocation3], 1 }
 0x15b   :  { %262 = vsyncpa [#allocation6], 1 }
 0x15c   :  { %263 = vsyncpa [#allocation9], 1 }
 0x15d   :  { %264 = vsyncpa [#allocation4], 1 }

</bundles_post_ra>
